<compile_context>
chip_gen: v5e
topology: v5e:2x2
jax: 0.10.0
libtpu: 0.0.40
codegen_flags: <defaults>
</compile_context>

<pallas_src>
import numpy as np
import jax
import jax.numpy as jnp
from jax.experimental import pallas as pl
from jax.experimental.pallas import tpu as pltpu

FIRST_MASKS = np.array(
    [
        [[0, 0, 0, 0, 0], [0, 0, 0, 0, 0], [0, 0, -1, 1, 0], [0, 0, 0, 0, 0], [0, 0, 0, 0, 0]],
        [[0, 0, 0, 0, 0], [0, 0, 0, 0, 0], [0, 1, -2, 1, 0], [0, 0, 0, 0, 0], [0, 0, 0, 0, 0]],
        [[0, 0, 0, 0, 0], [0, -1, 2, -1, 0], [0, 2, -4, 2, 0], [0, -1, 2, -1, 0], [0, 0, 0, 0, 0]],
        [[-1, 2, -2, 2, -1], [2, -6, 8, -6, 2], [-2, 8, -12, 8, -2], [2, -6, 8, -6, 2], [-1, 2, -2, 2, -1]],
    ],
    dtype=np.float32,
)

SECOND_MASKS = np.array(
    [
        [[0, 0, 0, 0, 0], [0, 0, 1, 0, 0], [0, 0, -1, 0, 0], [0, 0, 0, 0, 0], [0, 0, 0, 0, 0]],
        [[0, 0, 0, 0, 0], [0, 0, 1, 0, 0], [0, 0, -2, 0, 0], [0, 0, 1, 0, 0], [0, 0, 0, 0, 0]],
        [[0, 0, 0, 0, 0], [0, -1, 2, -1, 0], [0, 2, -4, 2, 0], [0, -1, 2, -1, 0], [0, 0, 0, 0, 0]],
        [[-1, 2, -2, 2, -1], [2, -6, 8, -6, 2], [-2, 8, -12, 8, -2], [2, -6, 8, -6, 2], [-1, 2, -2, 2, -1]],
    ],
    dtype=np.float32,
)

# --- exact rank-1 decompositions: mask == sum_k outer(v_k, h_k) --------------
_DIFF_H = [((0, 0, 1, 0, 0), (0, 0, -1, 1, 0))]
_LAP_H = [((0, 0, 1, 0, 0), (0, 1, -2, 1, 0))]
_DIFF_V = [((0, 1, -1, 0, 0), (0, 0, 1, 0, 0))]
_LAP_V = [((0, 1, -2, 1, 0), (0, 0, 1, 0, 0))]
_SQ3 = [((0, 1, -2, 1, 0), (0, -1, 2, -1, 0))]
_KV = [((1, 0, -2, 0, 1), (-1, 2, -2, 2, -1)),
       ((0, 1, -2, 1, 0), (2, -6, 8, -6, 2))]


def _scaled_terms(raw_steps, masks):
    """Fold the x3 channel-sum factor of steps 1..3 into the horizontal taps
    and verify each decomposition reproduces (scale * mask) exactly."""
    out = []
    for step, terms in enumerate(raw_steps):
        scale = 1.0 if step == 0 else 3.0
        scaled = []
        recon = np.zeros((5, 5), np.float64)
        for v, h in terms:
            v_np = np.asarray(v, np.float64)
            h_np = np.asarray(h, np.float64) * scale
            recon += np.outer(v_np, h_np)
            scaled.append((tuple(float(x) for x in v_np), tuple(float(x) for x in h_np)))
        assert np.array_equal(recon, scale * masks[step].astype(np.float64)), step
        out.append(scaled)
    return out


FIRST_TERMS = _scaled_terms([_DIFF_H, _LAP_H, _SQ3, _KV], FIRST_MASKS)
SECOND_TERMS = _scaled_terms([_DIFF_V, _LAP_V, _SQ3, _KV], SECOND_MASKS)


def _wmul(w, arr):
    if w == 1.0:
        return arr
    if w == -1.0:
        return -arr
    return w * arr


def _make_kernel(H, W):
    f32 = jnp.float32

    def kernel(x_ref, o_ref, pad_ref, vp_ref):
        # x_ref:   (1, 3, H, W)
        # o_ref:   (1, 6, H, W)
        # pad_ref: (H+4, W+4) padded working plane with a 2-pixel zero border
        # vp_ref:  (H, W+4)  vertical-pass scratch for separable terms

        # Re-zero only the 2-pixel border (the center is fully overwritten on
        # every conv step).  Done every grid step so correctness does not rely
        # on scratch persistence or a program_id==0 guard (safe under v7x
        # megacore sharding of the batch axis).
        pad_ref[pl.ds(0, 2), pl.ds(0, W + 4)] = jnp.zeros((2, W + 4), f32)
        pad_ref[pl.ds(H + 2, 2), pl.ds(0, W + 4)] = jnp.zeros((2, W + 4), f32)
        pad_ref[pl.ds(0, H + 4), pl.ds(0, 2)] = jnp.zeros((H + 4, 2), f32)
        pad_ref[pl.ds(0, H + 4), pl.ds(W + 2, 2)] = jnp.zeros((H + 4, 2), f32)

        # Channel sum of the input, computed once, shared by both chains.
        cur0 = x_ref[0, 0] + x_ref[0, 1] + x_ref[0, 2]

        def conv_step(cur, terms):
            # Place the current plane in the padded-scratch center.
            pad_ref[pl.ds(2, H), pl.ds(2, W)] = cur
            out = None
            for v, h in terms:
                nzv = [(di, v[di]) for di in range(5) if v[di] != 0.0]
                nzh = [(dj, h[dj]) for dj in range(5) if h[dj] != 0.0]
                if len(nzv) == 1 or len(nzh) == 1:
                    # Few taps: direct 2-D accumulation.
                    for di, wv in nzv:
                        for dj, wh in nzh:
                            t = _wmul(wv * wh, pad_ref[pl.ds(di, H), pl.ds(dj, W)])
                            out = t if out is None else out + t
                else:
                    # Separable: vertical pass first (sublane-only offsets,
                    # full-width slabs -> no lane shifting), then a short
                    # lane-shifted horizontal pass on the slim slab.
                    vp = None
                    for di, wv in nzv:
                        t = _wmul(wv, pad_ref[pl.ds(di, H), pl.ds(0, W + 4)])
                        vp = t if vp is None else vp + t
                    vp_ref[...] = vp
                    for dj, wh in nzh:
                        t = _wmul(wh, vp_ref[pl.ds(0, H), pl.ds(dj, W)])
                        out = t if out is None else out + t
            return out

        def chain(terms_per_step):
            cur = cur0
            for step in range(4):
                cur = conv_step(cur, terms_per_step[step])
            return cur

        y1 = chain(FIRST_TERMS)
        y2 = chain(SECOND_TERMS)
        for c in range(3):
            o_ref[0, c] = y1
            o_ref[0, 3 + c] = y2

    return kernel


def cfen_preprocess(x):
    """x: (N, 3, H, W) float32 -> (N, 6, H, W) float32."""
    N, C, H, W = x.shape
    assert C == 3
    kernel = _make_kernel(H, W)
    return pl.pallas_call(
        kernel,
        out_shape=jax.ShapeDtypeStruct((N, 6, H, W), jnp.float32),
        grid_spec=pltpu.PrefetchScalarGridSpec(
            num_scalar_prefetch=0,
            grid=(N,),
            in_specs=[pl.BlockSpec((1, 3, H, W), lambda n: (n, 0, 0, 0))],
            out_specs=pl.BlockSpec((1, 6, H, W), lambda n: (n, 0, 0, 0)),
            scratch_shapes=[
                pltpu.VMEM((H + 4, W + 4), jnp.float32),
                pltpu.VMEM((H, W + 4), jnp.float32),
            ],
        ),
        compiler_params=pltpu.CompilerParams(dimension_semantics=("parallel",)),
    )(x.astype(jnp.float32))


def _reference(x):
    """Pure-JAX reference reproducing the PyTorch forward exactly."""

    def chain(inp, masks):
        cur = inp
        for i in range(4):
            w = jnp.tile(jnp.asarray(masks[i])[None, None], (3, 3, 1, 1))  # (O=3, I=3, 5, 5)
            cur = jax.lax.conv_general_dilated(
                cur, w, window_strides=(1, 1), padding=((2, 2), (2, 2)),
                dimension_numbers=("NCHW", "OIHW", "NCHW"),
            )
        return cur

    return jnp.concatenate([chain(x, FIRST_MASKS), chain(x, SECOND_MASKS)], axis=1)


if __name__ == "__main__":
    key = jax.random.PRNGKey(0)
    x = jax.random.normal(key, (2, 3, 16, 16), dtype=jnp.float32)

    out = cfen_preprocess(x)
    out = jax.block_until_ready(out)

    ref = jax.block_until_ready(_reference(x))
    assert out.shape == (2, 6, 16, 16)
    denom = float(jnp.max(jnp.abs(ref))) + 1.0
    rel_err = float(jnp.max(jnp.abs(out - ref))) / denom
    assert rel_err < 1e-4, f"relative error too large: {rel_err}"

    print("KERNEL_OK")
</pallas_src>

<mosaic_0001>
module attributes {stable_mosaic.version = 11 : i64} {
  func.func @kernel(%arg0: i32, %arg1: memref<1x3x16x16xf32, #tpu.memory_space<vmem>>, %arg2: memref<1x6x16x16xf32, #tpu.memory_space<vmem>>, %arg3: memref<20x20xf32, #tpu.memory_space<vmem>>, %arg4: memref<16x20xf32, #tpu.memory_space<vmem>>) attributes {dimension_semantics = [#tpu.dimension_semantics<parallel>], iteration_bounds = array<i64: 2>, scalar_prefetch = 0 : i64, scratch_operands = 2 : i64, tpu.core_type = #tpu.core_type<tc>, window_params = [{transform_indices = @transform_0, window_bounds = array<i64: 1, 3, 16, 16>}, {transform_indices = @transform_1, window_bounds = array<i64: 1, 6, 16, 16>}]} {
    %cst = arith.constant 0.000000e+00 : f32
    %0 = vector.broadcast %cst : f32 to vector<2x20xf32>
    %c0 = arith.constant 0 : index
    %c0_0 = arith.constant 0 : index
    %1 = vector.load %arg3[%c0, %c0_0] : memref<20x20xf32, #tpu.memory_space<vmem>>, vector<2x20xf32>
    tpu.vector_store %arg3[%c0, %c0_0], %0 {strides = array<i32>} : memref<20x20xf32, #tpu.memory_space<vmem>>, vector<2x20xf32>,
    %cst_1 = arith.constant 0.000000e+00 : f32
    %2 = vector.broadcast %cst_1 : f32 to vector<2x20xf32>
    %c18 = arith.constant 18 : index
    %c0_2 = arith.constant 0 : index
    %3 = vector.load %arg3[%c18, %c0_2] : memref<20x20xf32, #tpu.memory_space<vmem>>, vector<2x20xf32>
    tpu.vector_store %arg3[%c18, %c0_2], %2 {strides = array<i32>} : memref<20x20xf32, #tpu.memory_space<vmem>>, vector<2x20xf32>,
    %cst_3 = arith.constant 0.000000e+00 : f32
    %4 = vector.broadcast %cst_3 : f32 to vector<20x2xf32>
    %c0_4 = arith.constant 0 : index
    %c0_5 = arith.constant 0 : index
    %5 = vector.load %arg3[%c0_4, %c0_5] : memref<20x20xf32, #tpu.memory_space<vmem>>, vector<20x2xf32>
    tpu.vector_store %arg3[%c0_4, %c0_5], %4 {strides = array<i32>} : memref<20x20xf32, #tpu.memory_space<vmem>>, vector<20x2xf32>,
    %cst_6 = arith.constant 0.000000e+00 : f32
    %6 = vector.broadcast %cst_6 : f32 to vector<20x2xf32>
    %c0_7 = arith.constant 0 : index
    %c18_8 = arith.constant 18 : index
    %7 = vector.load %arg3[%c0_7, %c18_8] : memref<20x20xf32, #tpu.memory_space<vmem>>, vector<20x2xf32>
    tpu.vector_store %arg3[%c0_7, %c18_8], %6 {strides = array<i32>} : memref<20x20xf32, #tpu.memory_space<vmem>>, vector<20x2xf32>,
    %c0_9 = arith.constant 0 : index
    %c0_10 = arith.constant 0 : index
    %c0_11 = arith.constant 0 : index
    %c0_12 = arith.constant 0 : index
    %8 = vector.load %arg1[%c0_9, %c0_10, %c0_11, %c0_12] : memref<1x3x16x16xf32, #tpu.memory_space<vmem>>, vector<1x1x16x16xf32>
    %9 = vector.shape_cast %8 : vector<1x1x16x16xf32> to vector<16x16xf32>
    %c0_13 = arith.constant 0 : index
    %c1 = arith.constant 1 : index
    %c0_14 = arith.constant 0 : index
    %c0_15 = arith.constant 0 : index
    %10 = vector.load %arg1[%c0_13, %c1, %c0_14, %c0_15] : memref<1x3x16x16xf32, #tpu.memory_space<vmem>>, vector<1x1x16x16xf32>
    %11 = vector.shape_cast %10 : vector<1x1x16x16xf32> to vector<16x16xf32>
    %12 = arith.addf %9, %11 : vector<16x16xf32>
    %c0_16 = arith.constant 0 : index
    %c2 = arith.constant 2 : index
    %c0_17 = arith.constant 0 : index
    %c0_18 = arith.constant 0 : index
    %13 = vector.load %arg1[%c0_16, %c2, %c0_17, %c0_18] : memref<1x3x16x16xf32, #tpu.memory_space<vmem>>, vector<1x1x16x16xf32>
    %14 = vector.shape_cast %13 : vector<1x1x16x16xf32> to vector<16x16xf32>
    %15 = arith.addf %12, %14 : vector<16x16xf32>
    %c2_19 = arith.constant 2 : index
    %c2_20 = arith.constant 2 : index
    %16 = vector.load %arg3[%c2_19, %c2_20] : memref<20x20xf32, #tpu.memory_space<vmem>>, vector<16x16xf32>
    tpu.vector_store %arg3[%c2_19, %c2_20], %15 {strides = array<i32>} : memref<20x20xf32, #tpu.memory_space<vmem>>, vector<16x16xf32>,
    %c2_21 = arith.constant 2 : index
    %c2_22 = arith.constant 2 : index
    %17 = vector.load %arg3[%c2_21, %c2_22] : memref<20x20xf32, #tpu.memory_space<vmem>>, vector<16x16xf32>
    %cst_23 = arith.constant 0.000000e+00 : f32
    %18 = vector.broadcast %cst_23 : f32 to vector<16x16xf32>
    %19 = arith.subf %18, %17 : vector<16x16xf32>
    %c2_24 = arith.constant 2 : index
    %c3 = arith.constant 3 : index
    %20 = vector.load %arg3[%c2_24, %c3] : memref<20x20xf32, #tpu.memory_space<vmem>>, vector<16x16xf32>
    %21 = arith.addf %19, %20 : vector<16x16xf32>
    %c2_25 = arith.constant 2 : index
    %c2_26 = arith.constant 2 : index
    %22 = vector.load %arg3[%c2_25, %c2_26] : memref<20x20xf32, #tpu.memory_space<vmem>>, vector<16x16xf32>
    tpu.vector_store %arg3[%c2_25, %c2_26], %21 {strides = array<i32>} : memref<20x20xf32, #tpu.memory_space<vmem>>, vector<16x16xf32>,
    %c2_27 = arith.constant 2 : index
    %c1_28 = arith.constant 1 : index
    %23 = vector.load %arg3[%c2_27, %c1_28] : memref<20x20xf32, #tpu.memory_space<vmem>>, vector<16x16xf32>
    %cst_29 = arith.constant 3.000000e+00 : f32
    %24 = vector.broadcast %cst_29 : f32 to vector<16x16xf32>
    %25 = arith.mulf %24, %23 : vector<16x16xf32>
    %c2_30 = arith.constant 2 : index
    %c2_31 = arith.constant 2 : index
    %26 = vector.load %arg3[%c2_30, %c2_31] : memref<20x20xf32, #tpu.memory_space<vmem>>, vector<16x16xf32>
    %cst_32 = arith.constant -6.000000e+00 : f32
    %27 = vector.broadcast %cst_32 : f32 to vector<16x16xf32>
    %28 = arith.mulf %27, %26 : vector<16x16xf32>
    %29 = arith.addf %25, %28 : vector<16x16xf32>
    %c2_33 = arith.constant 2 : index
    %c3_34 = arith.constant 3 : index
    %30 = vector.load %arg3[%c2_33, %c3_34] : memref<20x20xf32, #tpu.memory_space<vmem>>, vector<16x16xf32>
    %cst_35 = arith.constant 3.000000e+00 : f32
    %31 = vector.broadcast %cst_35 : f32 to vector<16x16xf32>
    %32 = arith.mulf %31, %30 : vector<16x16xf32>
    %33 = arith.addf %29, %32 : vector<16x16xf32>
    %c2_36 = arith.constant 2 : index
    %c2_37 = arith.constant 2 : index
    %34 = vector.load %arg3[%c2_36, %c2_37] : memref<20x20xf32, #tpu.memory_space<vmem>>, vector<16x16xf32>
    tpu.vector_store %arg3[%c2_36, %c2_37], %33 {strides = array<i32>} : memref<20x20xf32, #tpu.memory_space<vmem>>, vector<16x16xf32>,
    %c1_38 = arith.constant 1 : index
    %c0_39 = arith.constant 0 : index
    %35 = vector.load %arg3[%c1_38, %c0_39] : memref<20x20xf32, #tpu.memory_space<vmem>>, vector<16x20xf32>
    %c2_40 = arith.constant 2 : index
    %c0_41 = arith.constant 0 : index
    %36 = vector.load %arg3[%c2_40, %c0_41] : memref<20x20xf32, #tpu.memory_space<vmem>>, vector<16x20xf32>
    %cst_42 = arith.constant -2.000000e+00 : f32
    %37 = vector.broadcast %cst_42 : f32 to vector<16x20xf32>
    %38 = arith.mulf %37, %36 : vector<16x20xf32>
    %39 = arith.addf %35, %38 : vector<16x20xf32>
    %c3_43 = arith.constant 3 : index
    %c0_44 = arith.constant 0 : index
    %40 = vector.load %arg3[%c3_43, %c0_44] : memref<20x20xf32, #tpu.memory_space<vmem>>, vector<16x20xf32>
    %41 = arith.addf %39, %40 : vector<16x20xf32>
    %c0_45 = arith.constant 0 : index
    %c0_46 = arith.constant 0 : index
    %42 = vector.load %arg4[%c0_45, %c0_46] : memref<16x20xf32, #tpu.memory_space<vmem>>, vector<16x20xf32>
    tpu.vector_store %arg4[%c0_45, %c0_46], %41 {strides = array<i32>} : memref<16x20xf32, #tpu.memory_space<vmem>>, vector<16x20xf32>,
    %c0_47 = arith.constant 0 : index
    %c1_48 = arith.constant 1 : index
    %43 = vector.load %arg4[%c0_47, %c1_48] : memref<16x20xf32, #tpu.memory_space<vmem>>, vector<16x16xf32>
    %cst_49 = arith.constant -3.000000e+00 : f32
    %44 = vector.broadcast %cst_49 : f32 to vector<16x16xf32>
    %45 = arith.mulf %44, %43 : vector<16x16xf32>
    %c0_50 = arith.constant 0 : index
    %c2_51 = arith.constant 2 : index
    %46 = vector.load %arg4[%c0_50, %c2_51] : memref<16x20xf32, #tpu.memory_space<vmem>>, vector<16x16xf32>
    %cst_52 = arith.constant 6.000000e+00 : f32
    %47 = vector.broadcast %cst_52 : f32 to vector<16x16xf32>
    %48 = arith.mulf %47, %46 : vector<16x16xf32>
    %49 = arith.addf %45, %48 : vector<16x16xf32>
    %c0_53 = arith.constant 0 : index
    %c3_54 = arith.constant 3 : index
    %50 = vector.load %arg4[%c0_53, %c3_54] : memref<16x20xf32, #tpu.memory_space<vmem>>, vector<16x16xf32>
    %cst_55 = arith.constant -3.000000e+00 : f32
    %51 = vector.broadcast %cst_55 : f32 to vector<16x16xf32>
    %52 = arith.mulf %51, %50 : vector<16x16xf32>
    %53 = arith.addf %49, %52 : vector<16x16xf32>
    %c2_56 = arith.constant 2 : index
    %c2_57 = arith.constant 2 : index
    %54 = vector.load %arg3[%c2_56, %c2_57] : memref<20x20xf32, #tpu.memory_space<vmem>>, vector<16x16xf32>
    tpu.vector_store %arg3[%c2_56, %c2_57], %53 {strides = array<i32>} : memref<20x20xf32, #tpu.memory_space<vmem>>, vector<16x16xf32>,
    %c0_58 = arith.constant 0 : index
    %c0_59 = arith.constant 0 : index
    %55 = vector.load %arg3[%c0_58, %c0_59] : memref<20x20xf32, #tpu.memory_space<vmem>>, vector<16x20xf32>
    %c2_60 = arith.constant 2 : index
    %c0_61 = arith.constant 0 : index
    %56 = vector.load %arg3[%c2_60, %c0_61] : memref<20x20xf32, #tpu.memory_space<vmem>>, vector<16x20xf32>
    %cst_62 = arith.constant -2.000000e+00 : f32
    %57 = vector.broadcast %cst_62 : f32 to vector<16x20xf32>
    %58 = arith.mulf %57, %56 : vector<16x20xf32>
    %59 = arith.addf %55, %58 : vector<16x20xf32>
    %c4 = arith.constant 4 : index
    %c0_63 = arith.constant 0 : index
    %60 = vector.load %arg3[%c4, %c0_63] : memref<20x20xf32, #tpu.memory_space<vmem>>, vector<16x20xf32>
    %61 = arith.addf %59, %60 : vector<16x20xf32>
    %c0_64 = arith.constant 0 : index
    %c0_65 = arith.constant 0 : index
    %62 = vector.load %arg4[%c0_64, %c0_65] : memref<16x20xf32, #tpu.memory_space<vmem>>, vector<16x20xf32>
    tpu.vector_store %arg4[%c0_64, %c0_65], %61 {strides = array<i32>} : memref<16x20xf32, #tpu.memory_space<vmem>>, vector<16x20xf32>,
    %c0_66 = arith.constant 0 : index
    %c0_67 = arith.constant 0 : index
    %63 = vector.load %arg4[%c0_66, %c0_67] : memref<16x20xf32, #tpu.memory_space<vmem>>, vector<16x16xf32>
    %cst_68 = arith.constant -3.000000e+00 : f32
    %64 = vector.broadcast %cst_68 : f32 to vector<16x16xf32>
    %65 = arith.mulf %64, %63 : vector<16x16xf32>
    %c0_69 = arith.constant 0 : index
    %c1_70 = arith.constant 1 : index
    %66 = vector.load %arg4[%c0_69, %c1_70] : memref<16x20xf32, #tpu.memory_space<vmem>>, vector<16x16xf32>
    %cst_71 = arith.constant 6.000000e+00 : f32
    %67 = vector.broadcast %cst_71 : f32 to vector<16x16xf32>
    %68 = arith.mulf %67, %66 : vector<16x16xf32>
    %69 = arith.addf %65, %68 : vector<16x16xf32>
    %c0_72 = arith.constant 0 : index
    %c2_73 = arith.constant 2 : index
    %70 = vector.load %arg4[%c0_72, %c2_73] : memref<16x20xf32, #tpu.memory_space<vmem>>, vector<16x16xf32>
    %cst_74 = arith.constant -6.000000e+00 : f32
    %71 = vector.broadcast %cst_74 : f32 to vector<16x16xf32>
    %72 = arith.mulf %71, %70 : vector<16x16xf32>
    %73 = arith.addf %69, %72 : vector<16x16xf32>
    %c0_75 = arith.constant 0 : index
    %c3_76 = arith.constant 3 : index
    %74 = vector.load %arg4[%c0_75, %c3_76] : memref<16x20xf32, #tpu.memory_space<vmem>>, vector<16x16xf32>
    %cst_77 = arith.constant 6.000000e+00 : f32
    %75 = vector.broadcast %cst_77 : f32 to vector<16x16xf32>
    %76 = arith.mulf %75, %74 : vector<16x16xf32>
    %77 = arith.addf %73, %76 : vector<16x16xf32>
    %c0_78 = arith.constant 0 : index
    %c4_79 = arith.constant 4 : index
    %78 = vector.load %arg4[%c0_78, %c4_79] : memref<16x20xf32, #tpu.memory_space<vmem>>, vector<16x16xf32>
    %cst_80 = arith.constant -3.000000e+00 : f32
    %79 = vector.broadcast %cst_80 : f32 to vector<16x16xf32>
    %80 = arith.mulf %79, %78 : vector<16x16xf32>
    %81 = arith.addf %77, %80 : vector<16x16xf32>
    %c1_81 = arith.constant 1 : index
    %c0_82 = arith.constant 0 : index
    %82 = vector.load %arg3[%c1_81, %c0_82] : memref<20x20xf32, #tpu.memory_space<vmem>>, vector<16x20xf32>
    %c2_83 = arith.constant 2 : index
    %c0_84 = arith.constant 0 : index
    %83 = vector.load %arg3[%c2_83, %c0_84] : memref<20x20xf32, #tpu.memory_space<vmem>>, vector<16x20xf32>
    %cst_85 = arith.constant -2.000000e+00 : f32
    %84 = vector.broadcast %cst_85 : f32 to vector<16x20xf32>
    %85 = arith.mulf %84, %83 : vector<16x20xf32>
    %86 = arith.addf %82, %85 : vector<16x20xf32>
    %c3_86 = arith.constant 3 : index
    %c0_87 = arith.constant 0 : index
    %87 = vector.load %arg3[%c3_86, %c0_87] : memref<20x20xf32, #tpu.memory_space<vmem>>, vector<16x20xf32>
    %88 = arith.addf %86, %87 : vector<16x20xf32>
    %c0_88 = arith.constant 0 : index
    %c0_89 = arith.constant 0 : index
    %89 = vector.load %arg4[%c0_88, %c0_89] : memref<16x20xf32, #tpu.memory_space<vmem>>, vector<16x20xf32>
    tpu.vector_store %arg4[%c0_88, %c0_89], %88 {strides = array<i32>} : memref<16x20xf32, #tpu.memory_space<vmem>>, vector<16x20xf32>,
    %c0_90 = arith.constant 0 : index
    %c0_91 = arith.constant 0 : index
    %90 = vector.load %arg4[%c0_90, %c0_91] : memref<16x20xf32, #tpu.memory_space<vmem>>, vector<16x16xf32>
    %cst_92 = arith.constant 6.000000e+00 : f32
    %91 = vector.broadcast %cst_92 : f32 to vector<16x16xf32>
    %92 = arith.mulf %91, %90 : vector<16x16xf32>
    %93 = arith.addf %81, %92 : vector<16x16xf32>
    %c0_93 = arith.constant 0 : index
    %c1_94 = arith.constant 1 : index
    %94 = vector.load %arg4[%c0_93, %c1_94] : memref<16x20xf32, #tpu.memory_space<vmem>>, vector<16x16xf32>
    %cst_95 = arith.constant -1.800000e+01 : f32
    %95 = vector.broadcast %cst_95 : f32 to vector<16x16xf32>
    %96 = arith.mulf %95, %94 : vector<16x16xf32>
    %97 = arith.addf %93, %96 : vector<16x16xf32>
    %c0_96 = arith.constant 0 : index
    %c2_97 = arith.constant 2 : index
    %98 = vector.load %arg4[%c0_96, %c2_97] : memref<16x20xf32, #tpu.memory_space<vmem>>, vector<16x16xf32>
    %cst_98 = arith.constant 2.400000e+01 : f32
    %99 = vector.broadcast %cst_98 : f32 to vector<16x16xf32>
    %100 = arith.mulf %99, %98 : vector<16x16xf32>
    %101 = arith.addf %97, %100 : vector<16x16xf32>
    %c0_99 = arith.constant 0 : index
    %c3_100 = arith.constant 3 : index
    %102 = vector.load %arg4[%c0_99, %c3_100] : memref<16x20xf32, #tpu.memory_space<vmem>>, vector<16x16xf32>
    %cst_101 = arith.constant -1.800000e+01 : f32
    %103 = vector.broadcast %cst_101 : f32 to vector<16x16xf32>
    %104 = arith.mulf %103, %102 : vector<16x16xf32>
    %105 = arith.addf %101, %104 : vector<16x16xf32>
    %c0_102 = arith.constant 0 : index
    %c4_103 = arith.constant 4 : index
    %106 = vector.load %arg4[%c0_102, %c4_103] : memref<16x20xf32, #tpu.memory_space<vmem>>, vector<16x16xf32>
    %cst_104 = arith.constant 6.000000e+00 : f32
    %107 = vector.broadcast %cst_104 : f32 to vector<16x16xf32>
    %108 = arith.mulf %107, %106 : vector<16x16xf32>
    %109 = arith.addf %105, %108 : vector<16x16xf32>
    %c2_105 = arith.constant 2 : index
    %c2_106 = arith.constant 2 : index
    %110 = vector.load %arg3[%c2_105, %c2_106] : memref<20x20xf32, #tpu.memory_space<vmem>>, vector<16x16xf32>
    tpu.vector_store %arg3[%c2_105, %c2_106], %15 {strides = array<i32>} : memref<20x20xf32, #tpu.memory_space<vmem>>, vector<16x16xf32>,
    %c1_107 = arith.constant 1 : index
    %c2_108 = arith.constant 2 : index
    %111 = vector.load %arg3[%c1_107, %c2_108] : memref<20x20xf32, #tpu.memory_space<vmem>>, vector<16x16xf32>
    %c2_109 = arith.constant 2 : index
    %c2_110 = arith.constant 2 : index
    %112 = vector.load %arg3[%c2_109, %c2_110] : memref<20x20xf32, #tpu.memory_space<vmem>>, vector<16x16xf32>
    %cst_111 = arith.constant 0.000000e+00 : f32
    %113 = vector.broadcast %cst_111 : f32 to vector<16x16xf32>
    %114 = arith.subf %113, %112 : vector<16x16xf32>
    %115 = arith.addf %111, %114 : vector<16x16xf32>
    %c2_112 = arith.constant 2 : index
    %c2_113 = arith.constant 2 : index
    %116 = vector.load %arg3[%c2_112, %c2_113] : memref<20x20xf32, #tpu.memory_space<vmem>>, vector<16x16xf32>
    tpu.vector_store %arg3[%c2_112, %c2_113], %115 {strides = array<i32>} : memref<20x20xf32, #tpu.memory_space<vmem>>, vector<16x16xf32>,
    %c1_114 = arith.constant 1 : index
    %c2_115 = arith.constant 2 : index
    %117 = vector.load %arg3[%c1_114, %c2_115] : memref<20x20xf32, #tpu.memory_space<vmem>>, vector<16x16xf32>
    %cst_116 = arith.constant 3.000000e+00 : f32
    %118 = vector.broadcast %cst_116 : f32 to vector<16x16xf32>
    %119 = arith.mulf %118, %117 : vector<16x16xf32>
    %c2_117 = arith.constant 2 : index
    %c2_118 = arith.constant 2 : index
    %120 = vector.load %arg3[%c2_117, %c2_118] : memref<20x20xf32, #tpu.memory_space<vmem>>, vector<16x16xf32>
    %cst_119 = arith.constant -6.000000e+00 : f32
    %121 = vector.broadcast %cst_119 : f32 to vector<16x16xf32>
    %122 = arith.mulf %121, %120 : vector<16x16xf32>
    %123 = arith.addf %119, %122 : vector<16x16xf32>
    %c3_120 = arith.constant 3 : index
    %c2_121 = arith.constant 2 : index
    %124 = vector.load %arg3[%c3_120, %c2_121] : memref<20x20xf32, #tpu.memory_space<vmem>>, vector<16x16xf32>
    %cst_122 = arith.constant 3.000000e+00 : f32
    %125 = vector.broadcast %cst_122 : f32 to vector<16x16xf32>
    %126 = arith.mulf %125, %124 : vector<16x16xf32>
    %127 = arith.addf %123, %126 : vector<16x16xf32>
    %c2_123 = arith.constant 2 : index
    %c2_124 = arith.constant 2 : index
    %128 = vector.load %arg3[%c2_123, %c2_124] : memref<20x20xf32, #tpu.memory_space<vmem>>, vector<16x16xf32>
    tpu.vector_store %arg3[%c2_123, %c2_124], %127 {strides = array<i32>} : memref<20x20xf32, #tpu.memory_space<vmem>>, vector<16x16xf32>,
    %c1_125 = arith.constant 1 : index
    %c0_126 = arith.constant 0 : index
    %129 = vector.load %arg3[%c1_125, %c0_126] : memref<20x20xf32, #tpu.memory_space<vmem>>, vector<16x20xf32>
    %c2_127 = arith.constant 2 : index
    %c0_128 = arith.constant 0 : index
    %130 = vector.load %arg3[%c2_127, %c0_128] : memref<20x20xf32, #tpu.memory_space<vmem>>, vector<16x20xf32>
    %cst_129 = arith.constant -2.000000e+00 : f32
    %131 = vector.broadcast %cst_129 : f32 to vector<16x20xf32>
    %132 = arith.mulf %131, %130 : vector<16x20xf32>
    %133 = arith.addf %129, %132 : vector<16x20xf32>
    %c3_130 = arith.constant 3 : index
    %c0_131 = arith.constant 0 : index
    %134 = vector.load %arg3[%c3_130, %c0_131] : memref<20x20xf32, #tpu.memory_space<vmem>>, vector<16x20xf32>
    %135 = arith.addf %133, %134 : vector<16x20xf32>
    %c0_132 = arith.constant 0 : index
    %c0_133 = arith.constant 0 : index
    %136 = vector.load %arg4[%c0_132, %c0_133] : memref<16x20xf32, #tpu.memory_space<vmem>>, vector<16x20xf32>
    tpu.vector_store %arg4[%c0_132, %c0_133], %135 {strides = array<i32>} : memref<16x20xf32, #tpu.memory_space<vmem>>, vector<16x20xf32>,
    %c0_134 = arith.constant 0 : index
    %c1_135 = arith.constant 1 : index
    %137 = vector.load %arg4[%c0_134, %c1_135] : memref<16x20xf32, #tpu.memory_space<vmem>>, vector<16x16xf32>
    %cst_136 = arith.constant -3.000000e+00 : f32
    %138 = vector.broadcast %cst_136 : f32 to vector<16x16xf32>
    %139 = arith.mulf %138, %137 : vector<16x16xf32>
    %c0_137 = arith.constant 0 : index
    %c2_138 = arith.constant 2 : index
    %140 = vector.load %arg4[%c0_137, %c2_138] : memref<16x20xf32, #tpu.memory_space<vmem>>, vector<16x16xf32>
    %cst_139 = arith.constant 6.000000e+00 : f32
    %141 = vector.broadcast %cst_139 : f32 to vector<16x16xf32>
    %142 = arith.mulf %141, %140 : vector<16x16xf32>
    %143 = arith.addf %139, %142 : vector<16x16xf32>
    %c0_140 = arith.constant 0 : index
    %c3_141 = arith.constant 3 : index
    %144 = vector.load %arg4[%c0_140, %c3_141] : memref<16x20xf32, #tpu.memory_space<vmem>>, vector<16x16xf32>
    %cst_142 = arith.constant -3.000000e+00 : f32
    %145 = vector.broadcast %cst_142 : f32 to vector<16x16xf32>
    %146 = arith.mulf %145, %144 : vector<16x16xf32>
    %147 = arith.addf %143, %146 : vector<16x16xf32>
    %c2_143 = arith.constant 2 : index
    %c2_144 = arith.constant 2 : index
    %148 = vector.load %arg3[%c2_143, %c2_144] : memref<20x20xf32, #tpu.memory_space<vmem>>, vector<16x16xf32>
    tpu.vector_store %arg3[%c2_143, %c2_144], %147 {strides = array<i32>} : memref<20x20xf32, #tpu.memory_space<vmem>>, vector<16x16xf32>,
    %c0_145 = arith.constant 0 : index
    %c0_146 = arith.constant 0 : index
    %149 = vector.load %arg3[%c0_145, %c0_146] : memref<20x20xf32, #tpu.memory_space<vmem>>, vector<16x20xf32>
    %c2_147 = arith.constant 2 : index
    %c0_148 = arith.constant 0 : index
    %150 = vector.load %arg3[%c2_147, %c0_148] : memref<20x20xf32, #tpu.memory_space<vmem>>, vector<16x20xf32>
    %cst_149 = arith.constant -2.000000e+00 : f32
    %151 = vector.broadcast %cst_149 : f32 to vector<16x20xf32>
    %152 = arith.mulf %151, %150 : vector<16x20xf32>
    %153 = arith.addf %149, %152 : vector<16x20xf32>
    %c4_150 = arith.constant 4 : index
    %c0_151 = arith.constant 0 : index
    %154 = vector.load %arg3[%c4_150, %c0_151] : memref<20x20xf32, #tpu.memory_space<vmem>>, vector<16x20xf32>
    %155 = arith.addf %153, %154 : vector<16x20xf32>
    %c0_152 = arith.constant 0 : index
    %c0_153 = arith.constant 0 : index
    %156 = vector.load %arg4[%c0_152, %c0_153] : memref<16x20xf32, #tpu.memory_space<vmem>>, vector<16x20xf32>
    tpu.vector_store %arg4[%c0_152, %c0_153], %155 {strides = array<i32>} : memref<16x20xf32, #tpu.memory_space<vmem>>, vector<16x20xf32>,
    %c0_154 = arith.constant 0 : index
    %c0_155 = arith.constant 0 : index
    %157 = vector.load %arg4[%c0_154, %c0_155] : memref<16x20xf32, #tpu.memory_space<vmem>>, vector<16x16xf32>
    %cst_156 = arith.constant -3.000000e+00 : f32
    %158 = vector.broadcast %cst_156 : f32 to vector<16x16xf32>
    %159 = arith.mulf %158, %157 : vector<16x16xf32>
    %c0_157 = arith.constant 0 : index
    %c1_158 = arith.constant 1 : index
    %160 = vector.load %arg4[%c0_157, %c1_158] : memref<16x20xf32, #tpu.memory_space<vmem>>, vector<16x16xf32>
    %cst_159 = arith.constant 6.000000e+00 : f32
    %161 = vector.broadcast %cst_159 : f32 to vector<16x16xf32>
    %162 = arith.mulf %161, %160 : vector<16x16xf32>
    %163 = arith.addf %159, %162 : vector<16x16xf32>
    %c0_160 = arith.constant 0 : index
    %c2_161 = arith.constant 2 : index
    %164 = vector.load %arg4[%c0_160, %c2_161] : memref<16x20xf32, #tpu.memory_space<vmem>>, vector<16x16xf32>
    %cst_162 = arith.constant -6.000000e+00 : f32
    %165 = vector.broadcast %cst_162 : f32 to vector<16x16xf32>
    %166 = arith.mulf %165, %164 : vector<16x16xf32>
    %167 = arith.addf %163, %166 : vector<16x16xf32>
    %c0_163 = arith.constant 0 : index
    %c3_164 = arith.constant 3 : index
    %168 = vector.load %arg4[%c0_163, %c3_164] : memref<16x20xf32, #tpu.memory_space<vmem>>, vector<16x16xf32>
    %cst_165 = arith.constant 6.000000e+00 : f32
    %169 = vector.broadcast %cst_165 : f32 to vector<16x16xf32>
    %170 = arith.mulf %169, %168 : vector<16x16xf32>
    %171 = arith.addf %167, %170 : vector<16x16xf32>
    %c0_166 = arith.constant 0 : index
    %c4_167 = arith.constant 4 : index
    %172 = vector.load %arg4[%c0_166, %c4_167] : memref<16x20xf32, #tpu.memory_space<vmem>>, vector<16x16xf32>
    %cst_168 = arith.constant -3.000000e+00 : f32
    %173 = vector.broadcast %cst_168 : f32 to vector<16x16xf32>
    %174 = arith.mulf %173, %172 : vector<16x16xf32>
    %175 = arith.addf %171, %174 : vector<16x16xf32>
    %c1_169 = arith.constant 1 : index
    %c0_170 = arith.constant 0 : index
    %176 = vector.load %arg3[%c1_169, %c0_170] : memref<20x20xf32, #tpu.memory_space<vmem>>, vector<16x20xf32>
    %c2_171 = arith.constant 2 : index
    %c0_172 = arith.constant 0 : index
    %177 = vector.load %arg3[%c2_171, %c0_172] : memref<20x20xf32, #tpu.memory_space<vmem>>, vector<16x20xf32>
    %cst_173 = arith.constant -2.000000e+00 : f32
    %178 = vector.broadcast %cst_173 : f32 to vector<16x20xf32>
    %179 = arith.mulf %178, %177 : vector<16x20xf32>
    %180 = arith.addf %176, %179 : vector<16x20xf32>
    %c3_174 = arith.constant 3 : index
    %c0_175 = arith.constant 0 : index
    %181 = vector.load %arg3[%c3_174, %c0_175] : memref<20x20xf32, #tpu.memory_space<vmem>>, vector<16x20xf32>
    %182 = arith.addf %180, %181 : vector<16x20xf32>
    %c0_176 = arith.constant 0 : index
    %c0_177 = arith.constant 0 : index
    %183 = vector.load %arg4[%c0_176, %c0_177] : memref<16x20xf32, #tpu.memory_space<vmem>>, vector<16x20xf32>
    tpu.vector_store %arg4[%c0_176, %c0_177], %182 {strides = array<i32>} : memref<16x20xf32, #tpu.memory_space<vmem>>, vector<16x20xf32>,
    %c0_178 = arith.constant 0 : index
    %c0_179 = arith.constant 0 : index
    %184 = vector.load %arg4[%c0_178, %c0_179] : memref<16x20xf32, #tpu.memory_space<vmem>>, vector<16x16xf32>
    %cst_180 = arith.constant 6.000000e+00 : f32
    %185 = vector.broadcast %cst_180 : f32 to vector<16x16xf32>
    %186 = arith.mulf %185, %184 : vector<16x16xf32>
    %187 = arith.addf %175, %186 : vector<16x16xf32>
    %c0_181 = arith.constant 0 : index
    %c1_182 = arith.constant 1 : index
    %188 = vector.load %arg4[%c0_181, %c1_182] : memref<16x20xf32, #tpu.memory_space<vmem>>, vector<16x16xf32>
    %cst_183 = arith.constant -1.800000e+01 : f32
    %189 = vector.broadcast %cst_183 : f32 to vector<16x16xf32>
    %190 = arith.mulf %189, %188 : vector<16x16xf32>
    %191 = arith.addf %187, %190 : vector<16x16xf32>
    %c0_184 = arith.constant 0 : index
    %c2_185 = arith.constant 2 : index
    %192 = vector.load %arg4[%c0_184, %c2_185] : memref<16x20xf32, #tpu.memory_space<vmem>>, vector<16x16xf32>
    %cst_186 = arith.constant 2.400000e+01 : f32
    %193 = vector.broadcast %cst_186 : f32 to vector<16x16xf32>
    %194 = arith.mulf %193, %192 : vector<16x16xf32>
    %195 = arith.addf %191, %194 : vector<16x16xf32>
    %c0_187 = arith.constant 0 : index
    %c3_188 = arith.constant 3 : index
    %196 = vector.load %arg4[%c0_187, %c3_188] : memref<16x20xf32, #tpu.memory_space<vmem>>, vector<16x16xf32>
    %cst_189 = arith.constant -1.800000e+01 : f32
    %197 = vector.broadcast %cst_189 : f32 to vector<16x16xf32>
    %198 = arith.mulf %197, %196 : vector<16x16xf32>
    %199 = arith.addf %195, %198 : vector<16x16xf32>
    %c0_190 = arith.constant 0 : index
    %c4_191 = arith.constant 4 : index
    %200 = vector.load %arg4[%c0_190, %c4_191] : memref<16x20xf32, #tpu.memory_space<vmem>>, vector<16x16xf32>
    %cst_192 = arith.constant 6.000000e+00 : f32
    %201 = vector.broadcast %cst_192 : f32 to vector<16x16xf32>
    %202 = arith.mulf %201, %200 : vector<16x16xf32>
    %203 = arith.addf %199, %202 : vector<16x16xf32>
    %c0_193 = arith.constant 0 : index
    %c0_194 = arith.constant 0 : index
    %c0_195 = arith.constant 0 : index
    %c0_196 = arith.constant 0 : index
    %204 = vector.load %arg2[%c0_193, %c0_194, %c0_195, %c0_196] : memref<1x6x16x16xf32, #tpu.memory_space<vmem>>, vector<1x1x16x16xf32>
    %205 = vector.shape_cast %204 : vector<1x1x16x16xf32> to vector<16x16xf32>
    %206 = vector.shape_cast %109 : vector<16x16xf32> to vector<1x1x16x16xf32>
    tpu.vector_store %arg2[%c0_193, %c0_194, %c0_195, %c0_196], %206 {strides = array<i32>} : memref<1x6x16x16xf32, #tpu.memory_space<vmem>>, vector<1x1x16x16xf32>,
    %c0_197 = arith.constant 0 : index
    %c3_198 = arith.constant 3 : index
    %c0_199 = arith.constant 0 : index
    %c0_200 = arith.constant 0 : index
    %207 = vector.load %arg2[%c0_197, %c3_198, %c0_199, %c0_200] : memref<1x6x16x16xf32, #tpu.memory_space<vmem>>, vector<1x1x16x16xf32>
    %208 = vector.shape_cast %207 : vector<1x1x16x16xf32> to vector<16x16xf32>
    %209 = vector.shape_cast %203 : vector<16x16xf32> to vector<1x1x16x16xf32>
    tpu.vector_store %arg2[%c0_197, %c3_198, %c0_199, %c0_200], %209 {strides = array<i32>} : memref<1x6x16x16xf32, #tpu.memory_space<vmem>>, vector<1x1x16x16xf32>,
    %c0_201 = arith.constant 0 : index
    %c1_202 = arith.constant 1 : index
    %c0_203 = arith.constant 0 : index
    %c0_204 = arith.constant 0 : index
    %210 = vector.load %arg2[%c0_201, %c1_202, %c0_203, %c0_204] : memref<1x6x16x16xf32, #tpu.memory_space<vmem>>, vector<1x1x16x16xf32>
    %211 = vector.shape_cast %210 : vector<1x1x16x16xf32> to vector<16x16xf32>
    %212 = vector.shape_cast %109 : vector<16x16xf32> to vector<1x1x16x16xf32>
    tpu.vector_store %arg2[%c0_201, %c1_202, %c0_203, %c0_204], %212 {strides = array<i32>} : memref<1x6x16x16xf32, #tpu.memory_space<vmem>>, vector<1x1x16x16xf32>,
    %c0_205 = arith.constant 0 : index
    %c4_206 = arith.constant 4 : index
    %c0_207 = arith.constant 0 : index
    %c0_208 = arith.constant 0 : index
    %213 = vector.load %arg2[%c0_205, %c4_206, %c0_207, %c0_208] : memref<1x6x16x16xf32, #tpu.memory_space<vmem>>, vector<1x1x16x16xf32>
    %214 = vector.shape_cast %213 : vector<1x1x16x16xf32> to vector<16x16xf32>
    %215 = vector.shape_cast %203 : vector<16x16xf32> to vector<1x1x16x16xf32>
    tpu.vector_store %arg2[%c0_205, %c4_206, %c0_207, %c0_208], %215 {strides = array<i32>} : memref<1x6x16x16xf32, #tpu.memory_space<vmem>>, vector<1x1x16x16xf32>,
    %c0_209 = arith.constant 0 : index
    %c2_210 = arith.constant 2 : index
    %c0_211 = arith.constant 0 : index
    %c0_212 = arith.constant 0 : index
    %216 = vector.load %arg2[%c0_209, %c2_210, %c0_211, %c0_212] : memref<1x6x16x16xf32, #tpu.memory_space<vmem>>, vector<1x1x16x16xf32>
    %217 = vector.shape_cast %216 : vector<1x1x16x16xf32> to vector<16x16xf32>
    %218 = vector.shape_cast %109 : vector<16x16xf32> to vector<1x1x16x16xf32>
    tpu.vector_store %arg2[%c0_209, %c2_210, %c0_211, %c0_212], %218 {strides = array<i32>} : memref<1x6x16x16xf32, #tpu.memory_space<vmem>>, vector<1x1x16x16xf32>,
    %c0_213 = arith.constant 0 : index
    %c5 = arith.constant 5 : index
    %c0_214 = arith.constant 0 : index
    %c0_215 = arith.constant 0 : index
    %219 = vector.load %arg2[%c0_213, %c5, %c0_214, %c0_215] : memref<1x6x16x16xf32, #tpu.memory_space<vmem>>, vector<1x1x16x16xf32>
    %220 = vector.shape_cast %219 : vector<1x1x16x16xf32> to vector<16x16xf32>
    %221 = vector.shape_cast %203 : vector<16x16xf32> to vector<1x1x16x16xf32>
    tpu.vector_store %arg2[%c0_213, %c5, %c0_214, %c0_215], %221 {strides = array<i32>} : memref<1x6x16x16xf32, #tpu.memory_space<vmem>>, vector<1x1x16x16xf32>,
    return
  }
  func.func @transform_0(%arg0: i32) -> (i32, i32, i32, i32) {
    %c0_i32 = arith.constant 0 : i32
    %c0_i32_0 = arith.constant 0 : i32
    %c0_i32_1 = arith.constant 0 : i32
    %c0_i32_2 = arith.constant 0 : i32
    return %arg0, %c0_i32, %c0_i32_0, %c0_i32_1 : i32, i32, i32, i32
  }
  func.func @transform_1(%arg0: i32) -> (i32, i32, i32, i32) {
    %c0_i32 = arith.constant 0 : i32
    %c0_i32_0 = arith.constant 0 : i32
    %c0_i32_1 = arith.constant 0 : i32
    %c0_i32_2 = arith.constant 0 : i32
    return %arg0, %c0_i32, %c0_i32_0, %c0_i32_1 : i32, i32, i32, i32
  }
}

</mosaic_0001>

<bundles_post_ra>
// kernel: tpu_custom_call.1
= control target key start
LH: loop header
LB: loop body
LE: loop exit
PB: predicated region body
PF: predicated region fallthrough
CT: control target
= control target key end

     0   :  { %6 = vsyncpa [#allocation5], 0  ;;  %s1161_s0 = inlined_call_operand.hbm [shape: f32[2,3,16,16], index: 0, kind: input, shape index: {}]   ;;  %s1162_s1 = inlined_call_operand.hbm [shape: f32[2,6,16,16], index: 1, kind: output, shape index: {}]  }
   0x1   :  { %8 = vsyncpa [#allocation5 + $0x1], 0 }
   0x2   :  { %9 = vsyncpa [#allocation6], 0 }
   0x3   :  { %11 = vsyncpa [#allocation6 + $0x1], 0  ;;  %s910_s6 = smov 0   ;;  %s912_s7 = smov 0  }
   0x4   :  { %s914_s8 = smov 0   ;;  %s916_s9 = smov 0  }
   0x5 LB: > { %s931_s10 = sadd.s32 4294967295, %s887_s9   ;;  %s707_s11 = sadd.s32 4294967294, %s887_s9   ;;  %s887_s9 = sphi %s916_s9, %s1170_s9   ;;  %s883_s8 = sphi %s914_s8, %s1169_s8   ;;  %s879_s7 = sphi %s912_s7, %s1168_s7   ;;  %s875_s6 = sphi %s910_s6, %s1167_s6  }
   0x6   : > { %s935_s12 = sadd.s32 1, %s887_s9   ;;  %s24_s13 = sadd.s32 1, %s883_s8 }
   0x7   : > { %s21_s14 = ssub.s32 %s887_s9, %s935_s12  ;;  %p31_p0 = scmp.ne.s32.totalorder %s883_s8, %s879_s7 }
   0x8   : > { %p22_p1 = scmp.eq.s32.totalorder %s21_s14, 0  ;;  %p32_p2 = scmp.eq.s32.totalorder %s887_s9, 0 }
   0x9   : > { %p37_p3 = scmp.ne.s32.totalorder %s879_s7, %s875_s6  ;;  %p38_p4 = scmp.eq.s32.totalorder %s931_s10, 0 }
   0xa   : > { %s947_s15 = scalar_select %p22_p1, %s883_s8, %s24_s13  }
   0xb   : > { %p33_p5 = por %p32_p2, %p31_p0  ;;  %p949_p6 = por %p38_p4, %p37_p3 }
   0xc   : > { %p61_p7 = scmp.eq.s32.totalorder %s931_s10, 1  ;;  %p67_p8 = scmp.eq.s32.totalorder %s707_s11, 1 }
   0xd   : > { %p709_p9 = scmp.ge.s32.totalorder %s887_s9, 2  ;;  %p746_p10 = scmp.lt.s32.totalorder %s887_s9, 2 }
   0xe   : > { %p956_p11 = por %p61_p7, %p31_p0  ;;  %p960_p12 = por %p67_p8, %p37_p3 }
   0xf   : > { %s87_s19 = sand.u32 1, %s883_s8   ;;  %s730_s20 = smul.u32 48, %s887_s9 }
  0x10   : > { %s729_s21 = smul.u32 48, %s87_s19  ;;  %p969_p13 = pnand %p746_p10, %p33_p5 }
  0x11   : > { %s96_s24 = scalar_lea.hbm %s1161_s0, %s730_s20  ;;  %s88_s29 = scalar_lea.sflag [#allocation5], %s87_s19 }
  0x12   : > { %s97_s26 = sshll.u32 %s96_s24, 4  ;;  %s91_s27 = scalar_lea.vmem [#allocation4], %s729_s21  ;;  %s98_s26 = int_to_ptr.hbm [resolvable:$true] %s97_s26 }
  0x13   : > { %s99_s28 = sshll.u32 %s91_s27, 4  ;;  %s791_s30 = sshra.s32 %s98_s26, 4  ;;  %s100_s28 = int_to_ptr.vmem [resolvable:$true] %s99_s28  ;;  %s792_s30 = int_to_ptr.hbm [resolvable:$true] %s791_s30 }
  0x14   : > { %s793_s2 = scalar_lea.hbm %s792_s30, 48  ;;  %p795_p1 = pneg %p969_p13 }
  0x15   : > { %p794_p0 = scmp.ne.s32.totalorder %s792_s30, %s793_s2  ;;  %s798_s5 = scalar_lea.hbm %s1161_s0, 96 }
  0x16   : > { %p799_p4 = scmp.lt.s32.totalorder %s792_s30, %s1161_s0  ;;  %p800_p5 = scmp.lt.s32.totalorder %s798_s5, %s793_s2 }
  0x17   : > { %p796_p2 = pnand %p795_p1, %p794_p0 }
  0x18   : > { %p801_p7 = por %p800_p5, %p799_p4 }
  0x19   : > { %p797_p3 = pneg %p796_p2 }
  0x1b   : > { %p802_p8 = pnand %p801_p7, %p797_p3 }
  0x1d   : > { %805 = shalt.err (!%p802_p8)
}
  0x1e   : > { %s889_s14 = smov 128   ;;  %s890_s19 = smov 8  }
  0x1f   : > { %741 = dma.hbm_to_vmem [thread:$0]  (!%p969_p13), %s98_s26, 768, %s100_s28, %s88_s29, %s889_s14, %s889_s14, %s890_s19  }
  0x20   : > { %p711_p10 = scmp.ge.s32.totalorder %s887_s9, 1  ;;  %p107_p0 = scmp.lt.s32.totalorder %s887_s9, 3 }
  0x22   : > { %p108_p1 = pnand %p711_p10, %p107_p0 }
  0x23   : > { %s986_s20 = sand.u32 (!%p108_p1), 1, %s879_s7  }
  0x24   : > { %111 = sbr.rel (%p108_p1) target bundleno = 1290 (0x50a), region = 24  ;;  %s114_s22 = scalar_lea.sflag (!%p108_p1), [#allocation5], %s986_s20 }
  0x25   : > { %s731_s21 = smul.u32 (!%p108_p1), 48, %s986_s20 }
  0x27   : > { %s117_s23 = scalar_lea.vmem (!%p108_p1), [#allocation4], %s731_s21 }
  0x29   : > { %866 = dma.done.wait (%p949_p6), %s114_s22, 768  }
  0x2a   : > { %868 = vsyncadd (%p949_p6), %s114_s22, 4294966528  ;;  %vm137_vm0 = vcmask 156672   ;;  %vm140_vm1 = vcmask 15360   ;;  %vm145_vm2 = vcmask 162960   ;;  %v891_v0 = vmov 0.0   ;;  %v150_v1 = vld [vmem:[%s117_s23] sm:$0xff] }
  0x2b   : > { %138 = vst.msk [vmem:[#allocation2] sm:$0x3] %vm137_vm0, %v891_v0  ;;  %v712_v2 = vld [vmem:[%s117_s23 + $0x10] sm:$0xff]  ;;  %v714_v3 = vld [vmem:[%s117_s23 + $0x20] sm:$0xff]  ;;  %v151_v5 = vld [vmem:[%s117_s23 + $0x8] sm:$0xff]  ;;  %s892_s24 = smov 2  }
  0x2c   : > { %141 = vst.msk [vmem:[#allocation2] sm:$0xff] %vm140_vm1, %v891_v0  ;;  %v155_v4 = vadd.f32 %v712_v2, %v150_v1  ;;  %v713_v6 = vld [vmem:[%s117_s23 + $0x18] sm:$0xff]  ;;  %v715_v9 = vld [vmem:[%s117_s23 + $0x28] sm:$0xff]  ;;  %vm143_vm3 = vcmask 11264   ;;  %vm148_vm4 = vcmask 158864   ;;  %vm170_vm5 = vcmask 146448  }
  0x2d   : > { %142 = vst.msk [vmem:[#allocation2 + $0x8] sm:$0xff] %vm140_vm1, %v891_v0  ;;  %v156_v8 = vadd.f32 %v713_v6, %v151_v5  ;;  %s893_s16 = smov 127   ;;  %s894_s25 = smov 126   ;;  %vm237_vm6 = vcmask 162816   ;;  %vm600_vm7 = vcmask 130048  }
  0x2e   : > { %146 = vst.msk [vmem:[#allocation2] sm:$0xff] %vm145_vm2, %v891_v0  ;;  %v160_v7 = vadd.f32 %v714_v3, %v155_v4  ;;  %s895_s26 = smov 1   ;;  %s896_s27 = smov 124  }
  0x2f   : > { %147 = vst.msk [vmem:[#allocation2 + $0x8] sm:$0xff] %vm145_vm2, %v891_v0  ;;  %v161_v10 = vadd.f32 %v715_v9, %v156_v8  ;;  %s897_s28 = smov 125   ;;  %s732_s29 = smul.u32 96, %s986_s20 }
  0x30   : > { %139 = vst.msk [vmem:[#allocation2 + $0x12] sm:$0x3] %vm137_vm0, %v891_v0  ;;  %164 = vrot.lane.b32.xlu0 %v160_v7, %s892_s24  ;;  %s733_s2 = smul.u32 96, %s931_s10  ;;  %s619_s13 = scalar_lea.sflag [#allocation6], %s986_s20 }
  0x31   : > { %144 = vst.msk [vmem:[#allocation2 + $0x10] sm:$0xf] %vm143_vm3, %v891_v0  ;;  %s1086_s30 = scalar_lea.vmem [#allocation7], %s732_s29  ;;  %s841_s23 = scalar_lea.hbm %s1162_s1, 192 }
  0x32   : > { %149 = vst.msk [vmem:[#allocation2 + $0x10] sm:$0xf] %vm148_vm4, %v891_v0  ;;  %s630_s5 = scalar_lea.hbm %s1162_s1, %s733_s2  ;;  %s631_s10 = sshll.u32 %s1086_s30, 4  ;;  %s632_s10 = int_to_ptr.vmem [resolvable:$true] %s631_s10 }
  0x33   : > { %s633_s11 = sshll.u32 %s630_s5, 4  ;;  %s634_s11 = int_to_ptr.hbm [resolvable:$true] %s633_s11 }
  0x34   : > { %s835_s14 = sshra.s32 %s634_s11, 4  ;;  %s836_s14 = int_to_ptr.hbm [resolvable:$true] %s835_s14 }
  0x35   : > { %s837_s19 = scalar_lea.hbm %s836_s14, 96  ;;  %p842_p3 = scmp.lt.s32.totalorder %s836_s14, %s1162_s1 }
  0x36   : > { %p838_p6 = scmp.ne.s32.totalorder %s836_s14, %s837_s19  ;;  %p843_p4 = scmp.lt.s32.totalorder %s841_s23, %s837_s19 }
  0x38   : > { %166 = vrot.lane.b32.xlu0 %v161_v10, %s892_s24  ;;  %p839_p13 = pnand %p838_p6, %p956_p11  ;;  %p844_p5 = por %p843_p4, %p842_p3 }
  0x3a   : > { %p840_p2 = pneg %p839_p13 }
  0x3c   : > { %p845_p7 = pnand %p844_p5, %p840_p2 }
  0xa2   : > { %v994_v11 = vpop.permute.xlu0 %164 }
  0xa3   : > { %171 = vst.msk [vmem:[#allocation2 + $0x2] sm:$0xff] %vm170_vm5, %v994_v11 }
  0xaa   : > { %v998_v12 = vpop.permute.xlu0 %166  ;;  %v173_v13 = vld [vmem:[#allocation2 + $0x2] sm:$0xff] }
  0xab   : > { %172 = vst.msk [vmem:[#allocation2 + $0xa] sm:$0xff] %vm170_vm5, %v998_v12  ;;  %179 = vrot.lane.b32.xlu1 %v173_v13, %s893_s16  ;;  %v175_v15 = vsub.f32 0.0, %v173_v13 }
  0xb2   : > { %v174_v14 = vld [vmem:[#allocation2 + $0xa] sm:$0xff] }
  0xb3   : > { %181 = vrot.lane.b32.xlu1 %v174_v14, %s893_s16  ;;  %v176_v18 = vsub.f32 0.0, %v174_v14 }
 0x11d   : > { %v180_v16 = vpop.permute.xlu1 %179 }
 0x11e   : > { %v185_v17 = vadd.f32 %v180_v16, %v175_v15 }
 0x120   : > { %187 = vst.msk [vmem:[#allocation2 + $0x2] sm:$0xff] %vm170_vm5, %v185_v17 }
 0x125   : > { %v182_v19 = vpop.permute.xlu1 %181 }
 0x126   : > { %v186_v20 = vadd.f32 %v182_v19, %v176_v18 }
 0x127   : > { %v189_v21 = vld [vmem:[#allocation2 + $0x2] sm:$0xff] }
 0x128   : > { %188 = vst.msk [vmem:[#allocation2 + $0xa] sm:$0xff] %vm170_vm5, %v186_v20  ;;  %v193_v22 = vmul.f32 -6.0, %v189_v21  ;;  %v191_v23 = vmul.f32 3.0, %v189_v21 }
 0x12a   : > { %197 = vrot.lane.b32.xlu2 %v193_v22, %s893_s16  ;;  %207 = vrot.lane.b32.xlu0 %v191_v23, %s894_s25 }
 0x12f   : > { %v190_v24 = vld [vmem:[#allocation2 + $0xa] sm:$0xff] }
 0x130   : > { %v192_v25 = vmul.f32 3.0, %v190_v24  ;;  %v194_v26 = vmul.f32 -6.0, %v190_v24 }
 0x132   : > { %209 = vrot.lane.b32.xlu1 %v192_v25, %s894_s25  ;;  %199 = vrot.lane.b32.xlu2 %v194_v26, %s893_s16 }
 0x184   : > { %v198_v27 = vpop.permute.xlu2 %197 }
 0x185   : > { %v203_v28 = vadd.f32 %v198_v27, %v191_v23 }
 0x18c   : > { %v200_v31 = vpop.permute.xlu2 %199 }
 0x18d   : > { %v204_v32 = vadd.f32 %v200_v31, %v192_v25 }
 0x19c   : > { %v208_v29 = vpop.permute.xlu0 %207 }
 0x19d   : > { %v213_v30 = vadd.f32 %v208_v29, %v203_v28 }
 0x19f   : > { %217 = vrot.lane.b32.xlu2 %v213_v30, %s895_s26 }
 0x1a4   : > { %v210_v33 = vpop.permute.xlu1 %209 }
 0x1a5   : > { %v214_v34 = vadd.f32 %v210_v33, %v204_v32 }
 0x1a7   : > { %219 = vrot.lane.b32.xlu0 %v214_v34, %s895_s26 }
 0x1f9   : > { %v218_v35 = vpop.permute.xlu2 %217 }
 0x1fa   : > { %223 = vst.msk [vmem:[#allocation2 + $0x2] sm:$0xff] %vm170_vm5, %v218_v35 }
 0x201   : > { %v227_v36 = vld [vmem:[#allocation2 + $0x2] sm:$0xff] }
 0x202   : > { %v229_v38 = vmul.f32 -2.0, %v227_v36  ;;  %v225_v39 = vld [vmem:[#allocation2 + $0x1] sm:$0xff] }
 0x204   : > { %v231_v40 = vadd.f32 %v229_v38, %v225_v39 }
 0x219   : > { %v220_v37 = vpop.permute.xlu0 %219 }
 0x21a   : > { %224 = vst.msk [vmem:[#allocation2 + $0xa] sm:$0xff] %vm170_vm5, %v220_v37 }
 0x221   : > { %v228_v41 = vld [vmem:[#allocation2 + $0xa] sm:$0xff] }
 0x222   : > { %v233_v42 = vld [vmem:[#allocation2 + $0x3] sm:$0xff]  ;;  %v230_v43 = vmul.f32 -2.0, %v228_v41  ;;  %v234_v47 = vld [vmem:[#allocation2 + $0xb] sm:$0xff] }
 0x223   : > { %v235_v44 = vadd.f32 %v233_v42, %v231_v40  ;;  %v226_v45 = vld [vmem:[#allocation2 + $0x9] sm:$0xff] }
 0x224   : > { %v232_v46 = vadd.f32 %v230_v43, %v226_v45 }
 0x225   : > { %238 = vst.msk [vmem:[#allocation3] sm:$0xff] %vm237_vm6, %v235_v44 }
 0x226   : > { %v236_v48 = vadd.f32 %v234_v47, %v232_v46 }
 0x228   : > { %239 = vst.msk [vmem:[#allocation3 + $0x8] sm:$0xff] %vm237_vm6, %v236_v48 }
 0x22c   : > { %v240_v49 = vld [vmem:[#allocation3] sm:$0xff] }
 0x22d   : > { %v244_v50 = vmul.f32 6.0, %v240_v49  ;;  %v242_v51 = vmul.f32 -3.0, %v240_v49 }
 0x22f   : > { %248 = vrot.lane.b32.xlu1 %v244_v50, %s893_s16  ;;  %258 = vrot.lane.b32.xlu0 %v242_v51, %s894_s25  ;;  %v241_v52 = vld [vmem:[#allocation3 + $0x8] sm:$0xff] }
 0x230   : > { %v245_v53 = vmul.f32 6.0, %v241_v52  ;;  %v243_v54 = vmul.f32 -3.0, %v241_v52 }
 0x232   : > { %250 = vrot.lane.b32.xlu2 %v245_v53, %s893_s16 }
 0x237   : > { %260 = vrot.lane.b32.xlu1 %v243_v54, %s894_s25 }
 0x28c   : > { %v251_v59 = vpop.permute.xlu2 %250 }
 0x28d   : > { %v255_v60 = vadd.f32 %v251_v59, %v243_v54 }
 0x2a1   : > { %v249_v55 = vpop.permute.xlu1 %248  ;;  %v259_v57 = vpop.permute.xlu0 %258 }
 0x2a2   : > { %v254_v56 = vadd.f32 %v249_v55, %v242_v51 }
 0x2a4   : > { %v264_v58 = vadd.f32 %v259_v57, %v254_v56 }
 0x2a6   : > { %268 = vrot.lane.b32.xlu2 %v264_v58, %s895_s26 }
 0x2a9   : > { %v261_v61 = vpop.permute.xlu1 %260 }
 0x2aa   : > { %v265_v62 = vadd.f32 %v261_v61, %v255_v60 }
 0x2ac   : > { %270 = vrot.lane.b32.xlu0 %v265_v62, %s895_s26 }
 0x300   : > { %v269_v63 = vpop.permute.xlu2 %268 }
 0x301   : > { %274 = vst.msk [vmem:[#allocation2 + $0x2] sm:$0xff] %vm170_vm5, %v269_v63 }
 0x308   : > { %v278_v0 = vld [vmem:[#allocation2 + $0x2] sm:$0xff] }
 0x309   : > { %v280_v2 = vmul.f32 -2.0, %v278_v0  ;;  %v276_v3 = vld [vmem:[#allocation2] sm:$0xff] }
 0x30a   : > { %v336_v5 = vld [vmem:[#allocation2 + $0x1] sm:$0xff] }
 0x30b   : > { %v282_v4 = vadd.f32 %v280_v2, %v276_v3  ;;  %v342_v19 = vadd.f32 %v336_v5, %v280_v2 }
 0x31e   : > { %v271_v1 = vpop.permute.xlu0 %270 }
 0x31f   : > { %275 = vst.msk [vmem:[#allocation2 + $0xa] sm:$0xff] %vm170_vm5, %v271_v1 }
 0x326   : > { %v277_v6 = vld [vmem:[#allocation2 + $0x8] sm:$0xff] }
 0x327   : > { %v279_v7 = vld [vmem:[#allocation2 + $0xa] sm:$0xff] }
 0x328   : > { %v284_v8 = vld [vmem:[#allocation2 + $0x4] sm:$0xff]  ;;  %v281_v9 = vmul.f32 -2.0, %v279_v7  ;;  %v285_v10 = vld [vmem:[#allocation2 + $0xc] sm:$0xff] }
 0x329   : > { %v337_v13 = vld [vmem:[#allocation2 + $0x9] sm:$0xff]  ;;  %v286_v15 = vadd.f32 %v284_v8, %v282_v4 }
 0x32a   : > { %v344_v14 = vld [vmem:[#allocation2 + $0x3] sm:$0xff]  ;;  %v345_v16 = vld [vmem:[#allocation2 + $0xb] sm:$0xff]  ;;  %v283_v17 = vadd.f32 %v281_v9, %v277_v6  ;;  %v343_v21 = vadd.f32 %v337_v13, %v281_v9 }
 0x32b   : > { %398 = vst.msk [vmem:[#allocation2 + $0x2] sm:$0xff] %vm170_vm5, %v994_v11  ;;  %v346_v24 = vadd.f32 %v344_v14, %v342_v19 }
 0x32c   : > { %399 = vst.msk [vmem:[#allocation2 + $0xa] sm:$0xff] %vm170_vm5, %v998_v12  ;;  %v287_v18 = vadd.f32 %v285_v10, %v283_v17  ;;  %v347_v29 = vadd.f32 %v345_v16, %v343_v21 }
 0x32d   : > { %288 = vst.msk [vmem:[#allocation3] sm:$0xff] %vm237_vm6, %v286_v15 }
 0x32e   : > { %289 = vst.msk [vmem:[#allocation3 + $0x8] sm:$0xff] %vm237_vm6, %v287_v18 }
 0x332   : > { %v402_v20 = vld [vmem:[#allocation2 + $0x2] sm:$0xff] }
 0x333   : > { %v403_v22 = vld [vmem:[#allocation2 + $0xa] sm:$0xff]  ;;  %v404_v23 = vsub.f32 0.0, %v402_v20  ;;  %v400_v25 = vld [vmem:[#allocation2 + $0x1] sm:$0xff] }
 0x334   : > { %v405_v26 = vsub.f32 0.0, %v403_v22  ;;  %v1030_v27 = vld [vmem:[#allocation3] sm:$0xff]  ;;  %v401_v11 = vld [vmem:[#allocation2 + $0x9] sm:$0xff] }
 0x335   : > { %v406_v28 = vadd.f32 %v404_v23, %v400_v25  ;;  %348 = vst.msk [vmem:[#allocation3] sm:$0xff] %vm237_vm6, %v346_v24  ;;  %v1034_v30 = vld [vmem:[#allocation3 + $0x8] sm:$0xff]  ;;  %v294_v4 = vmul.f32 6.0, %v1030_v27  ;;  %v292_v6 = vmul.f32 -3.0, %v1030_v27  ;;  %v306_v20 = vmul.f32 -6.0, %v1030_v27 }
 0x336   : > { %v407_v12 = vadd.f32 %v405_v26, %v401_v11  ;;  %349 = vst.msk [vmem:[#allocation3 + $0x8] sm:$0xff] %vm237_vm6, %v347_v29  ;;  %v295_v3 = vmul.f32 6.0, %v1034_v30  ;;  %v307_v5 = vmul.f32 -6.0, %v1034_v30  ;;  %v293_v21 = vmul.f32 -3.0, %v1034_v30 }
 0x337   : > { %408 = vst.msk [vmem:[#allocation2 + $0x2] sm:$0xff] %vm170_vm5, %v406_v28 }
 0x338   : > { %409 = vst.msk [vmem:[#allocation2 + $0xa] sm:$0xff] %vm170_vm5, %v407_v12 }
 0x33c   : > { %v350_v59 = vld [vmem:[#allocation3] sm:$0xff] }
 0x33d   : > { %v1040_v60 = vld [vmem:[#allocation3 + $0x8] sm:$0xff]  ;;  %v356_v8 = vmul.f32 -18.0, %v350_v59  ;;  %v368_v26 = vmul.f32 24.0, %v350_v59  ;;  %v352_v11 = vmul.f32 6.0, %v350_v59 }
 0x33e   : > { %v410_v31 = vld [vmem:[#allocation2 + $0x1] sm:$0xff]  ;;  %v357_v7 = vmul.f32 -18.0, %v1040_v60  ;;  %v369_v27 = vmul.f32 24.0, %v1040_v60  ;;  %v353_v59 = vmul.f32 6.0, %v1040_v60 }
 0x33f   : > { %v414_v32 = vld [vmem:[#allocation2 + $0x2] sm:$0xff]  ;;  %v412_v34 = vmul.f32 3.0, %v410_v31  ;;  %v415_v35 = vld [vmem:[#allocation2 + $0xa] sm:$0xff] }
 0x340   : > { %v411_v33 = vld [vmem:[#allocation2 + $0x9] sm:$0xff]  ;;  %v416_v36 = vmul.f32 -6.0, %v414_v32  ;;  %v417_v39 = vmul.f32 -6.0, %v415_v35 }
 0x341   : > { %v420_v37 = vld [vmem:[#allocation2 + $0x3] sm:$0xff]  ;;  %v413_v38 = vmul.f32 3.0, %v411_v33  ;;  %v421_v40 = vld [vmem:[#allocation2 + $0xb] sm:$0xff] }
 0x342   : > { %v418_v41 = vadd.f32 %v416_v36, %v412_v34  ;;  %v422_v42 = vmul.f32 3.0, %v420_v37  ;;  %v423_v44 = vmul.f32 3.0, %v421_v40 }
 0x343   : > { %v419_v43 = vadd.f32 %v417_v39, %v413_v38 }
 0x344   : > { %v424_v45 = vadd.f32 %v422_v42, %v418_v41 }
 0x345   : > { %v425_v46 = vadd.f32 %v423_v44, %v419_v43 }
 0x346   : > { %426 = vst.msk [vmem:[#allocation2 + $0x2] sm:$0xff] %vm170_vm5, %v424_v45 }
 0x347   : > { %427 = vst.msk [vmem:[#allocation2 + $0xa] sm:$0xff] %vm170_vm5, %v425_v46 }
 0x34d   : > { %v430_v47 = vld [vmem:[#allocation2 + $0x2] sm:$0xff] }
 0x34e   : > { %v431_v48 = vld [vmem:[#allocation2 + $0xa] sm:$0xff]  ;;  %v432_v49 = vmul.f32 -2.0, %v430_v47  ;;  %v428_v51 = vld [vmem:[#allocation2 + $0x1] sm:$0xff] }
 0x34f   : > { %v433_v50 = vmul.f32 -2.0, %v431_v48  ;;  %v429_v52 = vld [vmem:[#allocation2 + $0x9] sm:$0xff] }
 0x350   : > { %v434_v53 = vadd.f32 %v432_v49, %v428_v51  ;;  %v436_v55 = vld [vmem:[#allocation2 + $0x3] sm:$0xff]  ;;  %v437_v56 = vld [vmem:[#allocation2 + $0xb] sm:$0xff] }
 0x351   : > { %v435_v54 = vadd.f32 %v433_v50, %v429_v52 }
 0x352   : > { %v438_v57 = vadd.f32 %v436_v55, %v434_v53 }
 0x353   : > { %v439_v58 = vadd.f32 %v437_v56, %v435_v54 }
 0x354   : > { %440 = vst.msk [vmem:[#allocation3] sm:$0xff] %vm237_vm6, %v438_v57 }
 0x355   : > { %441 = vst.msk [vmem:[#allocation3 + $0x8] sm:$0xff] %vm237_vm6, %v439_v58 }
 0x35b   : > { %v442_v61 = vld [vmem:[#allocation3] sm:$0xff] }
 0x35c   : > { %v443_v62 = vld [vmem:[#allocation3 + $0x8] sm:$0xff]  ;;  %v446_v63 = vmul.f32 6.0, %v442_v61  ;;  %v444_v0 = vmul.f32 -3.0, %v442_v61 }
 0x35d   : > { %v447_v1 = vmul.f32 6.0, %v443_v62  ;;  %v445_v2 = vmul.f32 -3.0, %v443_v62 }
 0x35e   : > { %450 = vrot.lane.b32.xlu1 %v446_v63, %s893_s16  ;;  %460 = vrot.lane.b32.xlu0 %v444_v0, %s894_s25 }
 0x35f   : > { %452 = vrot.lane.b32.xlu2 %v447_v1, %s893_s16 }
 0x366   : > { %462 = vrot.lane.b32.xlu1 %v445_v2, %s894_s25 }
 0x367   : > { %300 = vrot.lane.b32.xlu2 %v295_v3, %s893_s16 }
 0x36e   : > { %298 = vrot.lane.b32.xlu1 %v294_v4, %s893_s16 }
 0x376   : > { %312 = vrot.lane.b32.xlu1 %v307_v5, %s894_s25 }
 0x37e   : > { %328 = vrot.lane.b32.xlu1 %v292_v6, %s896_s27 }
 0x386   : > { %362 = vrot.lane.b32.xlu1 %v357_v7, %s893_s16 }
 0x38e   : > { %380 = vrot.lane.b32.xlu1 %v356_v8, %s897_s28 }
 0x3b9   : > { %v453_v15 = vpop.permute.xlu2 %452 }
 0x3ba   : > { %v457_v16 = vadd.f32 %v453_v15, %v445_v2 }
 0x3c1   : > { %v301_v22 = vpop.permute.xlu2 %300 }
 0x3c2   : > { %v305_v23 = vadd.f32 %v301_v22, %v293_v21 }
 0x3d0   : > { %v451_v9 = vpop.permute.xlu1 %450  ;;  %v461_v13 = vpop.permute.xlu0 %460 }
 0x3d1   : > { %v456_v10 = vadd.f32 %v451_v9, %v444_v0 }
 0x3d3   : > { %v466_v14 = vadd.f32 %v461_v13, %v456_v10 }
 0x3d5   : > { %470 = vrot.lane.b32.xlu2 %v466_v14, %s895_s26 }
 0x3d8   : > { %v463_v17 = vpop.permute.xlu1 %462 }
 0x3d9   : > { %v467_v18 = vadd.f32 %v463_v17, %v457_v16 }
 0x3db   : > { %472 = vrot.lane.b32.xlu0 %v467_v18, %s895_s26 }
 0x3dd   : > { %318 = vrot.lane.b32.xlu2 %v294_v4, %s897_s28 }
 0x3e0   : > { %v299_v19 = vpop.permute.xlu1 %298 }
 0x3e1   : > { %v304_v38 = vadd.f32 %v299_v19, %v292_v6 }
 0x3e3   : > { %310 = vrot.lane.b32.xlu0 %v306_v20, %s894_s25 }
 0x3e5   : > { %330 = vrot.lane.b32.xlu2 %v293_v21, %s896_s27 }
 0x3e8   : > { %v313_v24 = vpop.permute.xlu1 %312 }
 0x3e9   : > { %v317_v25 = vadd.f32 %v313_v24, %v305_v23 }
 0x3eb   : > { %320 = vrot.lane.b32.xlu0 %v295_v3, %s897_s28 }
 0x3ed   : > { %372 = vrot.lane.b32.xlu2 %v368_v26, %s894_s25 }
 0x3f0   : > { %v329_v35 = vpop.permute.xlu1 %328 }
 0x3f3   : > { %360 = vrot.lane.b32.xlu0 %v356_v8, %s893_s16 }
 0x3f5   : > { %382 = vrot.lane.b32.xlu2 %v357_v7, %s897_s28 }
 0x3f8   : > { %v363_v56 = vpop.permute.xlu1 %362 }
 0x3fb   : > { %374 = vrot.lane.b32.xlu0 %v369_v27, %s894_s25 }
 0x3fd   : > { %390 = vrot.lane.b32.xlu2 %v352_v11, %s896_s27 }
 0x400   : > { %v381_v13 = vpop.permute.xlu1 %380 }
 0x42f   : > { %v471_v28 = vpop.permute.xlu2 %470 }
 0x430   : > { %476 = vst.msk [vmem:[#allocation2 + $0x2] sm:$0xff] %vm170_vm5, %v471_v28 }
 0x437   : > { %v319_v12 = vpop.permute.xlu2 %318  ;;  %v480_v31 = vld [vmem:[#allocation2 + $0x2] sm:$0xff] }
 0x438   : > { %v482_v32 = vmul.f32 -2.0, %v480_v31  ;;  %v478_v33 = vld [vmem:[#allocation2] sm:$0xff] }
 0x439   : > { %v538_v47 = vld [vmem:[#allocation2 + $0x1] sm:$0xff] }
 0x43a   : > { %v484_v34 = vadd.f32 %v482_v32, %v478_v33  ;;  %v544_v51 = vadd.f32 %v538_v47, %v482_v32 }
 0x43f   : > { %v331_v29 = vpop.permute.xlu2 %330 }
 0x447   : > { %v373_v41 = vpop.permute.xlu2 %372 }
 0x44d   : > { %v473_v30 = vpop.permute.xlu0 %472 }
 0x44e   : > { %477 = vst.msk [vmem:[#allocation2 + $0xa] sm:$0xff] %vm170_vm5, %v473_v30 }
 0x44f   : > { %v383_v1 = vpop.permute.xlu2 %382 }
 0x455   : > { %v311_v36 = vpop.permute.xlu0 %310  ;;  %v486_v37 = vld [vmem:[#allocation2 + $0x4] sm:$0xff]  ;;  %v487_v46 = vld [vmem:[#allocation2 + $0xc] sm:$0xff] }
 0x456   : > { %v488_v39 = vadd.f32 %v486_v37, %v484_v34  ;;  %v481_v40 = vld [vmem:[#allocation2 + $0xa] sm:$0xff]  ;;  %v316_v43 = vadd.f32 %v311_v36, %v304_v38 }
 0x457   : > { %v483_v42 = vmul.f32 -2.0, %v481_v40  ;;  %v479_v44 = vld [vmem:[#allocation2 + $0x8] sm:$0xff]  ;;  %v391_v15 = vpop.permute.xlu2 %390 }
 0x458   : > { %490 = vst.msk [vmem:[#allocation3] sm:$0xff] %vm237_vm6, %v488_v39  ;;  %v546_v48 = vld [vmem:[#allocation2 + $0x3] sm:$0xff]  ;;  %v324_v50 = vadd.f32 %v319_v12, %v316_v43  ;;  %v547_v2 = vld [vmem:[#allocation2 + $0xb] sm:$0xff] }
 0x459   : > { %v485_v45 = vadd.f32 %v483_v42, %v479_v44  ;;  %v548_v54 = vadd.f32 %v546_v48, %v544_v51  ;;  %v539_v55 = vld [vmem:[#allocation2 + $0x9] sm:$0xff] }
 0x45a   : > { %v545_v58 = vadd.f32 %v539_v55, %v483_v42  ;;  %v334_v0 = vadd.f32 %v329_v35, %v324_v50 }
 0x45b   : > { %v489_v49 = vadd.f32 %v487_v46, %v485_v45 }
 0x45c   : > { %v549_v4 = vadd.f32 %v547_v2, %v545_v58  ;;  %v354_v5 = vadd.f32 %v352_v11, %v334_v0 }
 0x45d   : > { %v321_v52 = vpop.permute.xlu0 %320  ;;  %491 = vst.msk [vmem:[#allocation3 + $0x8] sm:$0xff] %vm237_vm6, %v489_v49 }
 0x45e   : > { %v325_v53 = vadd.f32 %v321_v52, %v317_v25 }
 0x45f   : > { %v492_v57 = vld [vmem:[#allocation3] sm:$0xff] }
 0x460   : > { %v335_v61 = vadd.f32 %v331_v29, %v325_v53  ;;  %v496_v62 = vmul.f32 6.0, %v492_v57  ;;  %550 = vst.msk [vmem:[#allocation3] sm:$0xff] %vm237_vm6, %v548_v54  ;;  %v508_v63 = vmul.f32 -6.0, %v492_v57  ;;  %v494_v21 = vmul.f32 -3.0, %v492_v57 }
 0x462   : > { %500 = vrot.lane.b32.xlu2 %v496_v62, %s893_s16  ;;  %512 = vrot.lane.b32.xlu1 %v508_v63, %s894_s25  ;;  %v355_v3 = vadd.f32 %v353_v59, %v335_v61 }
 0x464   : > { %v493_v6 = vld [vmem:[#allocation3 + $0x8] sm:$0xff]  ;;  %v367_v17 = vadd.f32 %v363_v56, %v355_v3 }
 0x465   : > { %v361_v7 = vpop.permute.xlu0 %360  ;;  %v497_v8 = vmul.f32 6.0, %v493_v6  ;;  %551 = vst.msk [vmem:[#allocation3 + $0x8] sm:$0xff] %vm237_vm6, %v549_v4  ;;  %v509_v10 = vmul.f32 -6.0, %v493_v6  ;;  %v495_v24 = vmul.f32 -3.0, %v493_v6 }
 0x466   : > { %v366_v60 = vadd.f32 %v361_v7, %v354_v5 }
 0x467   : > { %502 = vrot.lane.b32.xlu0 %v497_v8, %s893_s16  ;;  %v552_v19 = vld [vmem:[#allocation3] sm:$0xff] }
 0x468   : > { %v378_v9 = vadd.f32 %v373_v41, %v366_v60  ;;  %v558_v22 = vmul.f32 -18.0, %v552_v19  ;;  %v570_v11 = vmul.f32 24.0, %v552_v19  ;;  %v554_v12 = vmul.f32 6.0, %v552_v19 }
 0x46a   : > { %v386_v14 = vadd.f32 %v381_v13, %v378_v9  ;;  %514 = vrot.lane.b32.xlu2 %v509_v10, %s894_s25  ;;  %522 = vrot.lane.b32.xlu1 %v497_v8, %s897_s28 }
 0x46c   : > { %v396_v16 = vadd.f32 %v391_v15, %v386_v14  ;;  %v553_v25 = vld [vmem:[#allocation3 + $0x8] sm:$0xff] }
 0x46d   : > { %v375_v18 = vpop.permute.xlu0 %374  ;;  %v559_v26 = vmul.f32 -18.0, %v553_v25  ;;  %v571_v27 = vmul.f32 24.0, %v553_v25  ;;  %v555_v28 = vmul.f32 6.0, %v553_v25 }
 0x46e   : > { %601 = vst.msk [vmem:[%s1086_s30] sm:$0xff] %vm600_vm7, %v396_v16  ;;  %v379_v20 = vadd.f32 %v375_v18, %v367_v17 }
 0x46f   : > { %718 = vst.msk [vmem:[%s1086_s30 + $0x10] sm:$0xff] %vm600_vm7, %v396_v16  ;;  %520 = vrot.lane.b32.xlu0 %v496_v62, %s897_s28 }
 0x470   : > { %722 = vst.msk [vmem:[%s1086_s30 + $0x20] sm:$0xff] %vm600_vm7, %v396_v16  ;;  %v1095_v23 = vadd.f32 %v383_v1, %v379_v20 }
 0x472   : > { %530 = vrot.lane.b32.xlu2 %v494_v21, %s896_s27  ;;  %562 = vrot.lane.b32.xlu1 %v558_v22, %s893_s16 }
 0x477   : > { %532 = vrot.lane.b32.xlu0 %v495_v24, %s896_s27 }
 0x47a   : > { %564 = vrot.lane.b32.xlu2 %v559_v26, %s893_s16  ;;  %576 = vrot.lane.b32.xlu1 %v571_v27, %s894_s25 }
 0x47f   : > { %574 = vrot.lane.b32.xlu0 %v570_v11, %s894_s25 }
 0x482   : > { %594 = vrot.lane.b32.xlu2 %v555_v28, %s896_s27  ;;  %584 = vrot.lane.b32.xlu1 %v559_v26, %s897_s28 }
 0x487   : > { %582 = vrot.lane.b32.xlu0 %v558_v22, %s897_s28 }
 0x48a   : > { %592 = vrot.lane.b32.xlu1 %v554_v12, %s896_s27 }
 0x48f   : > { %392 = vrot.lane.b32.xlu0 %v353_v59, %s896_s27 }
 0x4bc   : > { %v501_v29 = vpop.permute.xlu2 %500 }
 0x4bd   : > { %v506_v39 = vadd.f32 %v501_v29, %v494_v21 }
 0x4c4   : > { %v515_v31 = vpop.permute.xlu2 %514 }
 0x4cc   : > { %v531_v36 = vpop.permute.xlu2 %530 }
 0x4d4   : > { %v513_v30 = vpop.permute.xlu1 %512  ;;  %v565_v45 = vpop.permute.xlu2 %564 }
 0x4d5   : > { %v518_v41 = vadd.f32 %v513_v30, %v506_v39 }
 0x4d9   : > { %v503_v32 = vpop.permute.xlu0 %502 }
 0x4da   : > { %v507_v34 = vadd.f32 %v503_v32, %v495_v24 }
 0x4dc   : > { %v523_v33 = vpop.permute.xlu1 %522  ;;  %v519_v37 = vadd.f32 %v515_v31, %v507_v34  ;;  %v595_v55 = vpop.permute.xlu2 %594 }
 0x4de   : > { %v527_v40 = vadd.f32 %v523_v33, %v519_v37 }
 0x4e1   : > { %v521_v35 = vpop.permute.xlu0 %520 }
 0x4e2   : > { %v526_v44 = vadd.f32 %v521_v35, %v518_v41 }
 0x4e4   : > { %v563_v38 = vpop.permute.xlu1 %562  ;;  %v536_v48 = vadd.f32 %v531_v36, %v526_v44 }
 0x4e6   : > { %v556_v51 = vadd.f32 %v554_v12, %v536_v48 }
 0x4e8   : > { %v568_v56 = vadd.f32 %v563_v38, %v556_v51 }
 0x4e9   : > { %v533_v42 = vpop.permute.xlu0 %532 }
 0x4ea   : > { %v537_v43 = vadd.f32 %v533_v42, %v527_v40 }
 0x4ec   : > { %v557_v46 = vadd.f32 %v555_v28, %v537_v43  ;;  %v577_v47 = vpop.permute.xlu1 %576 }
 0x4ee   : > { %v569_v49 = vadd.f32 %v565_v45, %v557_v46 }
 0x4f0   : > { %v581_v52 = vadd.f32 %v577_v47, %v569_v49 }
 0x4f1   : > { %v575_v50 = vpop.permute.xlu0 %574 }
 0x4f2   : > { %v580_v58 = vadd.f32 %v575_v50, %v568_v56 }
 0x4f4   : > { %v585_v53 = vpop.permute.xlu1 %584 }
 0x4f5   : > { %v589_v54 = vadd.f32 %v585_v53, %v581_v52 }
 0x4f7   : > { %v599_v57 = vadd.f32 %v595_v55, %v589_v54 }
 0x4f9   : > { %717 = vst.msk [vmem:[%s1086_s30 + $0x38] sm:$0xff] %vm600_vm7, %v599_v57  ;;  %v583_v59 = vpop.permute.xlu0 %582 }
 0x4fa   : > { %721 = vst.msk [vmem:[%s1086_s30 + $0x48] sm:$0xff] %vm600_vm7, %v599_v57  ;;  %v588_v61 = vadd.f32 %v583_v59, %v580_v58 }
 0x4fb   : > { %725 = vst.msk [vmem:[%s1086_s30 + $0x58] sm:$0xff] %vm600_vm7, %v599_v57 }
 0x4fc   : > { %v593_v62 = vpop.permute.xlu1 %592 }
 0x4fd   : > { %v598_v63 = vadd.f32 %v593_v62, %v588_v61 }
 0x4ff   : > { %716 = vst.msk [vmem:[%s1086_s30 + $0x30] sm:$0xff] %vm600_vm7, %v598_v63 }
 0x500   : > { %720 = vst.msk [vmem:[%s1086_s30 + $0x40] sm:$0xff] %vm600_vm7, %v598_v63 }
 0x501   : > { %724 = vst.msk [vmem:[%s1086_s30 + $0x50] sm:$0xff] %vm600_vm7, %v598_v63  ;;  %v393_v0 = vpop.permute.xlu0 %392 }
 0x502   : > { %v397_v1 = vadd.f32 %v393_v0, %v1095_v23 }
 0x504   : > { %602 = vst.msk [vmem:[%s1086_s30 + $0x8] sm:$0xff] %vm600_vm7, %v397_v1 }
 0x505   : > { %719 = vst.msk [vmem:[%s1086_s30 + $0x18] sm:$0xff] %vm600_vm7, %v397_v1 }
 0x506   : > { %723 = vst.msk [vmem:[%s1086_s30 + $0x28] sm:$0xff] %vm600_vm7, %v397_v1 }
 0x507   : > { %848 = shalt.err (!%p845_p7)
}
 0x508   : > { %s898_s20 = smov 128   ;;  %s899_s25 = smov 8  }
 0x509   : > { %736 = dma.vmem_to_hbm [thread:$0]  (%p956_p11), %s632_s10, 1536, %s634_s11, %s619_s13, %s898_s20, %s898_s20, %s899_s25  }
 0x50a PF: > { %s648_s26 = sand.u32 1, %s875_s6   ;;  %p743_p8 = pnand %p709_p9, %p960_p12 }
 0x50b   : > { %s649_s27 = scalar_lea.sflag [#allocation6], %s648_s26 }
 0x50c   : > { %p744_p10 = pneg %p743_p8 }
 0x50e   : > { %870 = dma.done.wait (%p744_p10), %s649_s27, 1536  }
 0x50f   : > { %872 = vsyncadd (%p744_p10), %s649_s27, 4294965760  ;;  %p14_p0 = scmp.ge.s32.totalorder %s935_s12, 4   ;;  %s1167_s6 = smov %s879_s7 }
 0x510   : > { %s1168_s7 = smov %s883_s8  ;;  %s1169_s8 = smov %s947_s15 }
 0x511   : > { %s1170_s9 = smov %s935_s12  ;;  %16 = sbr.rel (!%p14_p0) target bundleno = 5 (0x5), region = 76 }
 0x516   :  { %655 = vsyncpa [#allocation5], 1 }
 0x517   :  { %657 = vsyncpa [#allocation5 + $0x1], 1 }
 0x518   :  { %658 = vsyncpa [#allocation6], 1 }
 0x519   :  { %660 = vsyncpa [#allocation6 + $0x1], 1 }

</bundles_post_ra>
